<compile_context>
chip_gen: v7x
topology: tpu7x:2x2x1
jax: 0.10.0
libtpu: 0.0.40
codegen_flags: <defaults>
</compile_context>

<pallas_src>
import functools

import jax
import jax.numpy as jnp
from jax.experimental import pallas as pl
from jax.experimental.pallas import tpu as pltpu

IN_DIM = 784        # full-extent block; no per-call pad of x (HBM-bound kernel).
HID_DIM = 100
OUT_DIM = 10
HID_PAD = 128       # 100 -> 128 (lane-dense hidden activations)
OUT_PAD = 128       # 10  -> 128 (lane-dense output stores)


def _round_up(x, m):
    return (x + m - 1) // m * m


def _cdiv(a, b):
    return -(-a // b)


def _choose_tiling(B, batch_tile):
    """Pick (tile_rows, num_tiles) so that padding is small, tiles are 16-row aligned,
    and there are >= 2 grid steps whenever B exceeds one native bf16 sublane tile
    (so v7x's second TensorCore gets work via the "parallel" grid axis)."""
    min_tiles = 2 if B > 16 else 1
    num_tiles = max(min_tiles, _cdiv(B, batch_tile))
    bt = _round_up(_cdiv(B, num_tiles), 16)
    return bt, num_tiles


def mlp_kernel(x_ref, w1_ref, w2_ref, w3_ref, o_ref):
    cdt = w1_ref.dtype  # compute dtype (bf16 or f32); accumulation is always f32
    # In-kernel cast of the x tile (no wrapper-side extra HBM pass over x).
    x = x_ref[...].astype(cdt)
    # fc_1 + relu
    h1 = jnp.dot(x, w1_ref[...], preferred_element_type=jnp.float32)
    h1 = jnp.maximum(h1, 0.0).astype(cdt)
    # fc_2 + relu
    h2 = jnp.dot(h1, w2_ref[...], preferred_element_type=jnp.float32)
    h2 = jnp.maximum(h2, 0.0).astype(cdt)
    # fc_3 (no activation); padded zero columns of w3 keep the extra output lanes at 0
    o_ref[...] = jnp.dot(h2, w3_ref[...],
                         preferred_element_type=jnp.float32).astype(o_ref.dtype)


def prepare_weights(w1, w2, w3, compute_dtype=jnp.bfloat16):
    """One-time (init-time) zero-pad of hidden/output dims to 128 lanes + dtype cast.
    Padded columns are provably inert through ReLU and are sliced off in the wrapper."""
    w1p = jnp.pad(w1, ((0, 0), (0, HID_PAD - HID_DIM))).astype(compute_dtype)
    w2p = jnp.pad(w2, ((0, HID_PAD - HID_DIM), (0, HID_PAD - HID_DIM))).astype(compute_dtype)
    w3p = jnp.pad(w3, ((0, HID_PAD - HID_DIM), (0, OUT_PAD - OUT_DIM))).astype(compute_dtype)
    return w1p, w2p, w3p


@functools.partial(jax.jit, static_argnames=("batch_tile",))
def mlp_forward(x, w1p, w2p, w3p, *, batch_tile=1024):
    """x: [B, 784] (f32 or bf16); w*p: prepared (padded + cast) weights from prepare_weights."""
    B, in_dim = x.shape
    assert in_dim == IN_DIM
    out_dtype = x.dtype                       # match nn.Linear: output dtype == input dtype
    compute_dtype = w1p.dtype

    bt, num_tiles = _choose_tiling(B, batch_tile)
    Bp = bt * num_tiles
    if Bp != B:
        # Small pad (at most a few tile-remainders); common power-of-two batches skip this.
        x = jnp.pad(x, ((0, Bp - B), (0, 0)))

    x_itemsize = jnp.dtype(x.dtype).itemsize
    w_itemsize = jnp.dtype(compute_dtype).itemsize
    flops = 2 * Bp * (IN_DIM * HID_PAD + HID_PAD * HID_PAD + HID_PAD * OUT_PAD)
    bytes_accessed = (
        Bp * IN_DIM * x_itemsize
        + (w1p.size + w2p.size + w3p.size) * w_itemsize
        + Bp * OUT_PAD * w_itemsize
    )

    out = pl.pallas_call(
        mlp_kernel,
        # Output stored in compute dtype (bf16 by default): halves padded-output writeback.
        out_shape=jax.ShapeDtypeStruct((Bp, OUT_PAD), compute_dtype),
        grid_spec=pltpu.PrefetchScalarGridSpec(
            num_scalar_prefetch=0,
            grid=(num_tiles,),
            in_specs=[
                # batch is tiled; weights use constant-index full blocks -> VMEM-resident
                pl.BlockSpec((bt, IN_DIM), lambda i: (i, 0)),
                pl.BlockSpec((IN_DIM, HID_PAD), lambda i: (0, 0)),
                pl.BlockSpec((HID_PAD, HID_PAD), lambda i: (0, 0)),
                pl.BlockSpec((HID_PAD, OUT_PAD), lambda i: (0, 0)),
            ],
            out_specs=pl.BlockSpec((bt, OUT_PAD), lambda i: (i, 0)),
        ),
        compiler_params=pltpu.CompilerParams(
            dimension_semantics=("parallel",),          # shards grid across TCs on v7x
            vmem_limit_bytes=32 * 1024 * 1024,          # bt<=2048 f32 x tiles fit comfortably
        ),
        cost_estimate=pl.CostEstimate(
            flops=flops, transcendentals=0, bytes_accessed=bytes_accessed),
    )(x, w1p, w2p, w3p)

    # Strip batch padding + lane-padded output columns; cast the 10 real columns back.
    return out[:B, :OUT_DIM].astype(out_dtype)


def init_params(key):
    k1, k2, k3 = jax.random.split(key, 3)
    # deterministic synthetic init (shapes match nn.Linear(in, out, bias=False),
    # stored transposed as [in, out])
    w1 = jax.random.normal(k1, (IN_DIM, HID_DIM), jnp.float32) * (1.0 / IN_DIM) ** 0.5
    w2 = jax.random.normal(k2, (HID_DIM, HID_DIM), jnp.float32) * (1.0 / HID_DIM) ** 0.5
    w3 = jax.random.normal(k3, (HID_DIM, OUT_DIM), jnp.float32) * (1.0 / HID_DIM) ** 0.5
    return w1, w2, w3


def _reference(x, w1, w2, w3):
    h = jnp.maximum(x @ w1, 0.0)
    h = jnp.maximum(h @ w2, 0.0)
    return h @ w3


if __name__ == "__main__":
    key = jax.random.PRNGKey(0)
    kx, kp = jax.random.split(key)
    batch = 16  # small example batch; wrapper handles any B
    x = jax.random.normal(kx, (batch, IN_DIM), jnp.float32)
    w1, w2, w3 = init_params(kp)
    ref = _reference(x, w1, w2, w3)

    # f32 path: tight tolerance (weights prepared once, outside the per-call path)
    wf32 = prepare_weights(w1, w2, w3, jnp.float32)
    out_f32 = mlp_forward(x, *wf32)
    jax.block_until_ready(out_f32)
    assert out_f32.shape == (batch, OUT_DIM)
    assert jnp.allclose(out_f32, ref, atol=1e-4, rtol=1e-4)

    # bf16 path (default): bf16 weights + in-kernel x cast, f32 accumulation, bf16 store
    wbf16 = prepare_weights(w1, w2, w3, jnp.bfloat16)
    out_bf16 = mlp_forward(x, *wbf16)
    jax.block_until_ready(out_bf16)
    assert out_bf16.shape == (batch, OUT_DIM)
    assert jnp.allclose(out_bf16, ref, atol=1e-1, rtol=1e-1)

    # multi-tile + remainder path (exercises grid=(2,) and batch padding), f32 for tight check
    batch2 = 37
    x2 = jax.random.normal(kx, (batch2, IN_DIM), jnp.float32)
    ref2 = _reference(x2, w1, w2, w3)
    out2 = mlp_forward(x2, *wf32)
    jax.block_until_ready(out2)
    assert out2.shape == (batch2, OUT_DIM)
    assert jnp.allclose(out2, ref2, atol=1e-4, rtol=1e-4)

    print("KERNEL_OK")
</pallas_src>

<mosaic_0001>
module attributes {stable_mosaic.version = 11 : i64} {
  func.func @mlp_kernel(%arg0: i32, %arg1: memref<16x784xf32, #tpu.memory_space<vmem>>, %arg2: memref<784x128xf32, #tpu.memory_space<vmem>>, %arg3: memref<128x128xf32, #tpu.memory_space<vmem>>, %arg4: memref<128x128xf32, #tpu.memory_space<vmem>>, %arg5: memref<16x128xf32, #tpu.memory_space<vmem>>) attributes {dimension_semantics = [#tpu.dimension_semantics<parallel>], iteration_bounds = array<i64: 1>, scalar_prefetch = 0 : i64, scratch_operands = 0 : i64, tpu.core_type = #tpu.core_type<tc>, window_params = [{transform_indices = @transform_0, window_bounds = array<i64: 16, 784>}, {pipeline_mode = #tpu.pipeline_mode<synchronous>, transform_indices = @transform_1, window_bounds = array<i64: 784, 128>}, {pipeline_mode = #tpu.pipeline_mode<synchronous>, transform_indices = @transform_2, window_bounds = array<i64: 128, 128>}, {pipeline_mode = #tpu.pipeline_mode<synchronous>, transform_indices = @transform_3, window_bounds = array<i64: 128, 128>}, {transform_indices = @transform_4, window_bounds = array<i64: 16, 128>}]} {
    %c0 = arith.constant 0 : index
    %c0_0 = arith.constant 0 : index
    %0 = vector.load %arg1[%c0, %c0_0] : memref<16x784xf32, #tpu.memory_space<vmem>>, vector<16x784xf32>
    %c0_1 = arith.constant 0 : index
    %c0_2 = arith.constant 0 : index
    %1 = vector.load %arg2[%c0_1, %c0_2] : memref<784x128xf32, #tpu.memory_space<vmem>>, vector<784x128xf32>
    %cst = arith.constant dense<0.000000e+00> : vector<16x128xf32>
    %2 = tpu.matmul %0, %1, %cst {dimension_numbers = #tpu.dot_dimension_numbers<[1], [0], [0], [1], [0, 0, 1, 1], [], []>} : vector<16x784xf32>, vector<784x128xf32>, vector<16x128xf32> -> vector<16x128xf32>
    %cst_3 = arith.constant 0.000000e+00 : f32
    %3 = vector.broadcast %cst_3 : f32 to vector<16x128xf32>
    %4 = arith.maximumf %2, %3 : vector<16x128xf32>
    %c0_4 = arith.constant 0 : index
    %c0_5 = arith.constant 0 : index
    %5 = vector.load %arg3[%c0_4, %c0_5] : memref<128x128xf32, #tpu.memory_space<vmem>>, vector<128x128xf32>
    %cst_6 = arith.constant dense<0.000000e+00> : vector<16x128xf32>
    %6 = tpu.matmul %4, %5, %cst_6 {dimension_numbers = #tpu.dot_dimension_numbers<[1], [0], [0], [1], [0, 0, 1, 1], [], []>} : vector<16x128xf32>, vector<128x128xf32>, vector<16x128xf32> -> vector<16x128xf32>
    %cst_7 = arith.constant 0.000000e+00 : f32
    %7 = vector.broadcast %cst_7 : f32 to vector<16x128xf32>
    %8 = arith.maximumf %6, %7 : vector<16x128xf32>
    %c0_8 = arith.constant 0 : index
    %c0_9 = arith.constant 0 : index
    %9 = vector.load %arg4[%c0_8, %c0_9] : memref<128x128xf32, #tpu.memory_space<vmem>>, vector<128x128xf32>
    %cst_10 = arith.constant dense<0.000000e+00> : vector<16x128xf32>
    %10 = tpu.matmul %8, %9, %cst_10 {dimension_numbers = #tpu.dot_dimension_numbers<[1], [0], [0], [1], [0, 0, 1, 1], [], []>} : vector<16x128xf32>, vector<128x128xf32>, vector<16x128xf32> -> vector<16x128xf32>
    %c0_11 = arith.constant 0 : index
    %c0_12 = arith.constant 0 : index
    %11 = vector.load %arg5[%c0_11, %c0_12] : memref<16x128xf32, #tpu.memory_space<vmem>>, vector<16x128xf32>
    tpu.vector_store %arg5[%c0_11, %c0_12], %10 {strides = array<i32>} : memref<16x128xf32, #tpu.memory_space<vmem>>, vector<16x128xf32>,
    return
  }
  func.func @transform_0(%arg0: i32) -> (i32, i32) {
    %c0_i32 = arith.constant 0 : i32
    %c0_i32_0 = arith.constant 0 : i32
    return %arg0, %c0_i32 : i32, i32
  }
  func.func @transform_1(%arg0: i32) -> (i32, i32) {
    %c0_i32 = arith.constant 0 : i32
    %c0_i32_0 = arith.constant 0 : i32
    %c0_i32_1 = arith.constant 0 : i32
    return %c0_i32, %c0_i32_0 : i32, i32
  }
  func.func @transform_2(%arg0: i32) -> (i32, i32) {
    %c0_i32 = arith.constant 0 : i32
    %c0_i32_0 = arith.constant 0 : i32
    %c0_i32_1 = arith.constant 0 : i32
    return %c0_i32, %c0_i32_0 : i32, i32
  }
  func.func @transform_3(%arg0: i32) -> (i32, i32) {
    %c0_i32 = arith.constant 0 : i32
    %c0_i32_0 = arith.constant 0 : i32
    %c0_i32_1 = arith.constant 0 : i32
    return %c0_i32, %c0_i32_0 : i32, i32
  }
  func.func @transform_4(%arg0: i32) -> (i32, i32) {
    %c0_i32 = arith.constant 0 : i32
    %c0_i32_0 = arith.constant 0 : i32
    return %arg0, %c0_i32 : i32, i32
  }
}

</mosaic_0001>

<bundles_post_ra>
// kernel: mlp_forward.1
= control target key start
LH: loop header
LB: loop body
LE: loop exit
PB: predicated region body
PF: predicated region fallthrough
CT: control target
= control target key end

     0   :  { %9 = vsyncpa [#allocation3], 0  ;;  %s1336_s0 = inlined_call_operand.hbm [shape: f32[16,784], index: 0, kind: input, shape index: {}]   ;;  %s1337_s1 = inlined_call_operand.hbm [shape: f32[784,128], index: 1, kind: input, shape index: {}]   ;;  %s1338_s2 = inlined_call_operand.hbm [shape: f32[128,128], index: 2, kind: input, shape index: {}]   ;;  %s1339_s3 = inlined_call_operand.hbm [shape: f32[128,128], index: 3, kind: input, shape index: {}]   ;;  %s1340_s4 = inlined_call_operand.hbm [shape: f32[16,128], index: 4, kind: output, shape index: {}]  }
   0x1   :  { %10 = vsyncpa [#allocation6], 0 }
   0x2   :  { %11 = vsyncpa [#allocation9], 0 }
   0x3   :  { %12 = vsyncpa [#allocation4], 0  ;;  %s1223_s15 = smov [#allocation5]   ;;  %s1105_s19 = scalar_lea.hbm %s1337_s1, 12544 }
   0x4   :  { %s30_s16 = sshll.u32 %s1223_s15, 4  ;;  %p1106_p0 = scmp.ne.s32.totalorder %s1337_s1, %s1105_s19  ;;  %s31_s16 = int_to_ptr.vmem [resolvable:$true] %s30_s16 }
   0x5   :  { %p1109_p1 = scmp.lt.u32.totalorder %s1105_s19, %s1337_s1 }
   0x7   :  { %p1111_p2 = pnand %p1109_p1, %p1106_p0 }
   0x9   :  { %1114 = shalt.err (!%p1111_p2)
}
   0xa   :  { %s1115_s24 = scalar_lea.vmem %s31_s16, 12544  ;;  %p1120_p4 = scmp.lt.s32.totalorder %s31_s16, %s31_s16 }
   0xb   :  { %p1116_p3 = scmp.ne.s32.totalorder %s31_s16, %s1115_s24  ;;  %p1121_p5 = scmp.lt.s32.totalorder %s1115_s24, %s1115_s24 }
   0xd   :  { %p1122_p6 = por %p1121_p5, %p1120_p4 }
   0xf   :  { %p1123_p7 = pnand %p1122_p6, %p1116_p3 }
  0x11   :  { %1126 = shalt.err (!%p1123_p7)
}
  0x12   :  { %s1224_s25 = smov 128   ;;  %s1225_s26 = smov 8  }
  0x13   :  { %36 = dma.hbm_to_vmem [thread:$0]  %s1337_s1, 12544, %s31_s16, [#allocation6], %s1224_s25, %s1224_s25, %s1225_s26  }
  0x14   :  { %s1226_s29 = smov [#allocation2]   ;;  %s1127_s7 = scalar_lea.hbm %s1336_s0, 1792 }
  0x15   :  { %s18_s30 = sshll.u32 %s1226_s29, 4  ;;  %p1128_p8 = scmp.ne.s32.totalorder %s1336_s0, %s1127_s7  ;;  %s19_s30 = int_to_ptr.vmem [resolvable:$true] %s18_s30 }
  0x16   :  { %p1131_p9 = scmp.lt.u32.totalorder %s1127_s7, %s1336_s0 }
  0x18   :  { %p1133_p10 = pnand %p1131_p9, %p1128_p8 }
  0x1a   :  { %1136 = shalt.err (!%p1133_p10)
}
  0x1b   :  { %s1137_s12 = scalar_lea.vmem %s19_s30, 1792  ;;  %p1142_p12 = scmp.lt.s32.totalorder %s19_s30, %s19_s30 }
  0x1c   :  { %p1138_p11 = scmp.ne.s32.totalorder %s19_s30, %s1137_s12  ;;  %p1143_p13 = scmp.lt.s32.totalorder %s1137_s12, %s1137_s12 }
  0x1e   :  { %p1144_p0 = por %p1143_p13, %p1142_p12 }
  0x20   :  { %p1145_p1 = pnand %p1144_p0, %p1138_p11 }
  0x22   :  { %1148 = shalt.err (!%p1145_p1)
}
  0x23   :  { %s1227_s1 = smov 896   ;;  %s1228_s13 = smov 56  }
  0x24   :  { %24 = dma.hbm_to_vmem [thread:$0]  %s1336_s0, 1792, %s19_s30, [#allocation3], %s1227_s1, %s1227_s1, %s1228_s13  }
  0x25   :  { %s1229_s16 = smov [#allocation7]   ;;  %s1230_s18 = smov [#allocation8]  }
  0x26   :  { %s42_s17 = sshll.u32 %s1229_s16, 4  ;;  %s54_s19 = sshll.u32 %s1230_s18, 4  ;;  %s43_s17 = int_to_ptr.vmem [resolvable:$true] %s42_s17  ;;  %s1284_s19 = int_to_ptr.vmem [resolvable:$true] %s54_s19 }
  0x27   :  { %s1149_s22 = scalar_lea.hbm %s1338_s2, 2048 }
  0x28   :  { %p1150_p2 = scmp.ne.s32.totalorder %s1338_s2, %s1149_s22  ;;  %p1153_p3 = scmp.lt.u32.totalorder %s1149_s22, %s1338_s2 }
  0x2a   :  { %p1155_p4 = pnand %p1153_p3, %p1150_p2 }
  0x2c   :  { %1158 = shalt.err (!%p1155_p4)
}
  0x2d   :  { %s1159_s0 = scalar_lea.vmem %s43_s17, 2048  ;;  %p1164_p6 = scmp.lt.s32.totalorder %s43_s17, %s43_s17 }
  0x2e   :  { %p1160_p5 = scmp.ne.s32.totalorder %s43_s17, %s1159_s0  ;;  %p1165_p7 = scmp.lt.s32.totalorder %s1159_s0, %s1159_s0 }
  0x30   :  { %p1166_p8 = por %p1165_p7, %p1164_p6 }
  0x32   :  { %p1167_p9 = pnand %p1166_p8, %p1160_p5 }
  0x34   :  { %1170 = shalt.err (!%p1167_p9)
}
  0x35   :  { %48 = dma.hbm_to_vmem [thread:$0]  %s1338_s2, 2048, %s43_s17, [#allocation6], %s1224_s25, %s1224_s25, %s1225_s26  }
  0x36   :  { %s1171_s7 = scalar_lea.hbm %s1339_s3, 2048 }
  0x37   :  { %p1172_p10 = scmp.ne.s32.totalorder %s1339_s3, %s1171_s7  ;;  %p1175_p11 = scmp.lt.u32.totalorder %s1171_s7, %s1339_s3 }
  0x39   :  { %p1177_p12 = pnand %p1175_p11, %p1172_p10 }
  0x3b   :  { %1180 = shalt.err (!%p1177_p12)
}
  0x3c   :  { %s1181_s12 = scalar_lea.vmem %s1284_s19, 2048  ;;  %p1186_p0 = scmp.lt.s32.totalorder %s1284_s19, %s1284_s19 }
  0x3d   :  { %p1182_p13 = scmp.ne.s32.totalorder %s1284_s19, %s1181_s12  ;;  %p1187_p1 = scmp.lt.s32.totalorder %s1181_s12, %s1181_s12 }
  0x3f   :  { %p1188_p2 = por %p1187_p1, %p1186_p0 }
  0x41   :  { %p1189_p3 = pnand %p1188_p2, %p1182_p13 }
  0x43   :  { %1192 = shalt.err (!%p1189_p3)
}
  0x44   :  { %60 = dma.hbm_to_vmem [thread:$0]  %s1339_s3, 2048, %s1284_s19, [#allocation9], %s1224_s25, %s1224_s25, %s1225_s26  }
  0x45   :  { %1215 = dma.done.wait [#allocation3], 1792  }
  0x46   :  { %1216 = vsyncadd [#allocation3], 4294965504 }
  0x47   :  { %1217 = dma.done.wait [#allocation6], 14592  }
  0x48   :  { %1218 = vsyncadd [#allocation6], 4294952704 }
  0x49   :  { %1219 = dma.done.wait [#allocation9], 2048  }
  0x4a   :  { %1220 = vsyncadd [#allocation9], 4294965248  ;;  %v103_v0 = vld [vmem:[#allocation5 + $0x80] sm:$0xff]  ;;  %v104_v1 = vld [vmem:[#allocation5 + $0x88] sm:$0xff]  ;;  %vm185_vm0 = vcmask 130048   ;;  %s1231_s3 = smov [#allocation10]  }
  0x4b   :  { %v135_v2 = vld [vmem:[#allocation5 + $0x180] sm:$0xff]  ;;  %v932_v3 = vpack.c.bf16 %v104_v1, %v103_v0  ;;  %v136_v4 = vld [vmem:[#allocation5 + $0x188] sm:$0xff]  ;;  %v105_v11 = vld [vmem:[#allocation5 + $0x90] sm:$0xff]  ;;  %s685_s13 = sshll.u32 %s1231_s3, 4  ;;  %s686_s13 = int_to_ptr.vmem [resolvable:$true] %s685_s13 }
  0x4c   :  { %v87_v5 = vld [vmem:[#allocation5] sm:$0xff]  ;;  %v88_v6 = vld [vmem:[#allocation5 + $0x8] sm:$0xff]  ;;  %v964_v7 = vpack.c.bf16 %v136_v4, %v135_v2  ;;  %v106_v13 = vld [vmem:[#allocation5 + $0x98] sm:$0xff]  ;;  %s1193_s14 = scalar_lea.vmem %s686_s13, 256  ;;  %p1198_p5 = scmp.lt.s32.totalorder %s686_s13, %s686_s13 }
  0x4d   :  { %v934_v8 = vpack.c.bf16 %v88_v6, %v87_v5  ;;  %v119_v9 = vld [vmem:[#allocation5 + $0x100] sm:$0xff]  ;;  %v120_v10 = vld [vmem:[#allocation5 + $0x108] sm:$0xff]  ;;  %933 = vmatprep.subr.bf16.mxu0 %v932_v3  ;;  %v137_v14 = vld [vmem:[#allocation5 + $0x190] sm:$0xff]  ;;  %v936_v16 = vpack.c.bf16 %v106_v13, %v105_v11  ;;  %p1194_p4 = scmp.ne.s32.totalorder %s686_s13, %s1193_s14  ;;  %p1199_p6 = scmp.lt.s32.totalorder %s1193_s14, %s1193_s14 }
  0x4e   :  { %v966_v12 = vpack.c.bf16 %v120_v10, %v119_v9  ;;  %v138_v15 = vld [vmem:[#allocation5 + $0x198] sm:$0xff]  ;;  %965 = vmatprep.subr.bf16.mxu1 %v964_v7  ;;  %v89_v18 = vld [vmem:[#allocation5 + $0x10] sm:$0xff]  ;;  %v107_v23 = vld [vmem:[#allocation5 + $0xa0] sm:$0xff] }
  0x4f   :  { %935 = vmatpush3.bf16.msra.mxu0 %v934_v8  ;;  %v968_v17 = vpack.c.bf16 %v138_v15, %v137_v14  ;;  %v90_v19 = vld [vmem:[#allocation5 + $0x18] sm:$0xff]  ;;  %v121_v20 = vld [vmem:[#allocation5 + $0x110] sm:$0xff]  ;;  %v108_v24 = vld [vmem:[#allocation5 + $0xa8] sm:$0xff]  ;;  %p1200_p7 = por %p1199_p6, %p1198_p5 }
  0x50   :  { %967 = vmatpush3.bf16.msra.mxu1 %v966_v12  ;;  %v938_v21 = vpack.c.bf16 %v90_v19, %v89_v18  ;;  %v122_v22 = vld [vmem:[#allocation5 + $0x118] sm:$0xff]  ;;  %937 = vmatprep.subr.bf16.mxu0 %v936_v16  ;;  %v940_v26 = vpack.c.bf16 %v108_v24, %v107_v23  ;;  %v139_v27 = vld [vmem:[#allocation5 + $0x1a0] sm:$0xff]  ;;  %v140_v28 = vld [vmem:[#allocation5 + $0x1a8] sm:$0xff] }
  0x51   :  { %969 = vmatprep.subr.bf16.mxu1 %v968_v17  ;;  %v970_v25 = vpack.c.bf16 %v122_v22, %v121_v20  ;;  %v91_v29 = vld [vmem:[#allocation5 + $0x20] sm:$0xff]  ;;  %v972_v30 = vpack.c.bf16 %v140_v28, %v139_v27  ;;  %v92_v31 = vld [vmem:[#allocation5 + $0x28] sm:$0xff]  ;;  %v109_v35 = vld [vmem:[#allocation5 + $0xb0] sm:$0xff]  ;;  %p1201_p8 = pnand %p1200_p7, %p1194_p4 }
  0x52   :  { %v123_v32 = vld [vmem:[#allocation5 + $0x120] sm:$0xff]  ;;  %v124_v33 = vld [vmem:[#allocation5 + $0x128] sm:$0xff]  ;;  %v942_v34 = vpack.c.bf16 %v92_v31, %v91_v29  ;;  %v110_v36 = vld [vmem:[#allocation5 + $0xb8] sm:$0xff] }
  0x53   :  { %939 = vmatpush3.bf16.msra.mxu0 %v938_v21  ;;  %v141_v37 = vld [vmem:[#allocation5 + $0x1b0] sm:$0xff]  ;;  %v974_v38 = vpack.c.bf16 %v124_v33, %v123_v32  ;;  %v944_v39 = vpack.c.bf16 %v110_v36, %v109_v35  ;;  %v142_v40 = vld [vmem:[#allocation5 + $0x1b8] sm:$0xff]  ;;  %v111_v46 = vld [vmem:[#allocation5 + $0xc0] sm:$0xff] }
  0x54   :  { %971 = vmatpush3.bf16.msra.mxu1 %v970_v25  ;;  %941 = vmatprep.subr.bf16.mxu0 %v940_v26  ;;  %v93_v41 = vld [vmem:[#allocation5 + $0x30] sm:$0xff]  ;;  %v94_v42 = vld [vmem:[#allocation5 + $0x38] sm:$0xff]  ;;  %v976_v43 = vpack.c.bf16 %v142_v40, %v141_v37  ;;  %v112_v47 = vld [vmem:[#allocation5 + $0xc8] sm:$0xff] }
  0x55   :  { %973 = vmatprep.subr.bf16.mxu1 %v972_v30  ;;  %v125_v44 = vld [vmem:[#allocation5 + $0x130] sm:$0xff]  ;;  %v126_v45 = vld [vmem:[#allocation5 + $0x138] sm:$0xff]  ;;  %v143_v48 = vld [vmem:[#allocation5 + $0x1c0] sm:$0xff]  ;;  %v946_v50 = vpack.c.bf16 %v94_v42, %v93_v41  ;;  %v948_v52 = vpack.c.bf16 %v112_v47, %v111_v46 }
  0x56   :  { %v144_v49 = vld [vmem:[#allocation5 + $0x1c8] sm:$0xff]  ;;  %v978_v51 = vpack.c.bf16 %v126_v45, %v125_v44  ;;  %v95_v53 = vld [vmem:[#allocation5 + $0x40] sm:$0xff]  ;;  %v113_v58 = vld [vmem:[#allocation5 + $0xd0] sm:$0xff] }
  0x57   :  { %943 = vmatpush3.bf16.msra.mxu0 %v942_v34  ;;  %v96_v54 = vld [vmem:[#allocation5 + $0x48] sm:$0xff]  ;;  %v127_v55 = vld [vmem:[#allocation5 + $0x140] sm:$0xff]  ;;  %v980_v56 = vpack.c.bf16 %v144_v49, %v143_v48  ;;  %v114_v59 = vld [vmem:[#allocation5 + $0xd8] sm:$0xff] }
  0x58   :  { %975 = vmatpush3.bf16.msra.mxu1 %v974_v38  ;;  %945 = vmatprep.subr.bf16.mxu0 %v944_v39  ;;  %v128_v57 = vld [vmem:[#allocation5 + $0x148] sm:$0xff]  ;;  %v145_v60 = vld [vmem:[#allocation5 + $0x1d0] sm:$0xff]  ;;  %v146_v61 = vld [vmem:[#allocation5 + $0x1d8] sm:$0xff]  ;;  %v950_v62 = vpack.c.bf16 %v96_v54, %v95_v53  ;;  %v952_v0 = vpack.c.bf16 %v114_v59, %v113_v58 }
  0x59   :  { %977 = vmatprep.subr.bf16.mxu1 %v976_v43  ;;  %v982_v63 = vpack.c.bf16 %v128_v57, %v127_v55  ;;  %v97_v1 = vld [vmem:[#allocation5 + $0x50] sm:$0xff]  ;;  %v98_v2 = vld [vmem:[#allocation5 + $0x58] sm:$0xff]  ;;  %v984_v4 = vpack.c.bf16 %v146_v61, %v145_v60  ;;  %v115_v6 = vld [vmem:[#allocation5 + $0xe0] sm:$0xff] }
  0x5a   :  { %v129_v3 = vld [vmem:[#allocation5 + $0x150] sm:$0xff]  ;;  %v130_v5 = vld [vmem:[#allocation5 + $0x158] sm:$0xff]  ;;  %v116_v7 = vld [vmem:[#allocation5 + $0xe8] sm:$0xff]  ;;  %v954_v10 = vpack.c.bf16 %v98_v2, %v97_v1 }
  0x5b   :  { %947 = vmatpush3.bf16.msra.mxu0 %v946_v50  ;;  %v147_v8 = vld [vmem:[#allocation5 + $0x1e0] sm:$0xff]  ;;  %v148_v9 = vld [vmem:[#allocation5 + $0x1e8] sm:$0xff]  ;;  %v986_v13 = vpack.c.bf16 %v130_v5, %v129_v3  ;;  %v956_v14 = vpack.c.bf16 %v116_v7, %v115_v6  ;;  %v74_v16 = vld [vmem:[#allocation2 + $0x8] sm:$0xff] }
  0x5c   :  { %979 = vmatpush3.bf16.msra.mxu1 %v978_v51  ;;  %949 = vmatprep.subr.bf16.mxu0 %v948_v52  ;;  %v99_v11 = vld [vmem:[#allocation5 + $0x60] sm:$0xff]  ;;  %v100_v12 = vld [vmem:[#allocation5 + $0x68] sm:$0xff]  ;;  %v988_v18 = vpack.c.bf16 %v148_v9, %v147_v8  ;;  %v117_v20 = vld [vmem:[#allocation5 + $0xf0] sm:$0xff] }
  0x5d   :  { %981 = vmatprep.subr.bf16.mxu1 %v980_v56  ;;  %v131_v15 = vld [vmem:[#allocation5 + $0x160] sm:$0xff]  ;;  %v76_v17 = vld [vmem:[#allocation2 + $0x18] sm:$0xff]  ;;  %v118_v21 = vld [vmem:[#allocation5 + $0xf8] sm:$0xff]  ;;  %256 = vmatprep.mubr.f32.mxu0 %v74_v16  ;;  %v958_v24 = vpack.c.bf16 %v100_v12, %v99_v11 }
  0x5e   :  { %v132_v19 = vld [vmem:[#allocation5 + $0x168] sm:$0xff]  ;;  %v149_v22 = vld [vmem:[#allocation5 + $0x1f0] sm:$0xff]  ;;  %v150_v23 = vld [vmem:[#allocation5 + $0x1f8] sm:$0xff]  ;;  %331 = vmatprep.mubr.f32.mxu1 %v76_v17  ;;  %v960_v26 = vpack.c.bf16 %v118_v21, %v117_v20 }
  0x5f   :  { %951 = vmatpush3.bf16.msra.mxu0 %v950_v62  ;;  %v990_v25 = vpack.c.bf16 %v132_v19, %v131_v15  ;;  %v101_v27 = vld [vmem:[#allocation5 + $0x70] sm:$0xff]  ;;  %v102_v28 = vld [vmem:[#allocation5 + $0x78] sm:$0xff]  ;;  %v992_v30 = vpack.c.bf16 %v150_v23, %v149_v22  ;;  %v167_v32 = vld [vmem:[#allocation5 + $0x280] sm:$0xff] }
  0x60   :  { %983 = vmatpush3.bf16.msra.mxu1 %v982_v63  ;;  %953 = vmatprep.subr.bf16.mxu0 %v952_v0  ;;  %v133_v29 = vld [vmem:[#allocation5 + $0x170] sm:$0xff]  ;;  %v134_v31 = vld [vmem:[#allocation5 + $0x178] sm:$0xff]  ;;  %v168_v33 = vld [vmem:[#allocation5 + $0x288] sm:$0xff]  ;;  %v962_v34 = vpack.c.bf16 %v102_v28, %v101_v27 }
  0x61   :  { %985 = vmatprep.subr.bf16.mxu1 %v984_v4  ;;  %v994_v35 = vpack.c.bf16 %v134_v31, %v133_v29  ;;  %v996_v36 = vpack.c.bf16 %v168_v33, %v167_v32  ;;  %v151_v37 = vld [vmem:[#allocation5 + $0x200] sm:$0xff]  ;;  %v152_v38 = vld [vmem:[#allocation5 + $0x208] sm:$0xff]  ;;  %v169_v39 = vld [vmem:[#allocation5 + $0x290] sm:$0xff] }
  0x62   :  { %v170_v40 = vld [vmem:[#allocation5 + $0x298] sm:$0xff]  ;;  %v73_v41 = vld [vmem:[#allocation2] sm:$0xff]  ;;  %v75_v42 = vld [vmem:[#allocation2 + $0x10] sm:$0xff]  ;;  %v998_v43 = vpack.c.bf16 %v152_v38, %v151_v37 }
  0x63   :  { %955 = vmatpush3.bf16.msra.mxu0 %v954_v10  ;;  %v1000_v44 = vpack.c.bf16 %v170_v40, %v169_v39  ;;  %v153_v45 = vld [vmem:[#allocation5 + $0x210] sm:$0xff]  ;;  %v154_v46 = vld [vmem:[#allocation5 + $0x218] sm:$0xff]  ;;  %v171_v47 = vld [vmem:[#allocation5 + $0x2a0] sm:$0xff] }
  0x64   :  { %987 = vmatpush3.bf16.msra.mxu1 %v986_v13  ;;  %957 = vmatprep.subr.bf16.mxu0 %v956_v14  ;;  %v172_v48 = vld [vmem:[#allocation5 + $0x2a8] sm:$0xff]  ;;  %v81_v49 = vld [vmem:[#allocation2 + $0x40] sm:$0xff]  ;;  %v183_v50 = vld [vmem:[#allocation5 + $0x300] sm:$0xff]  ;;  %v1002_v53 = vpack.c.bf16 %v154_v46, %v153_v45 }
  0x65   :  { %989 = vmatprep.subr.bf16.mxu1 %v988_v18  ;;  %v83_v51 = vld [vmem:[#allocation2 + $0x50] sm:$0xff]  ;;  %v184_v52 = vld [vmem:[#allocation5 + $0x308] sm:$0xff]  ;;  %v1004_v56 = vpack.c.bf16 %v172_v48, %v171_v47  ;;  %v82_v59 = vld [vmem:[#allocation2 + $0x48] sm:$0xff] }
  0x66   :  { %v80_v54 = vld [vmem:[#allocation2 + $0x38] sm:$0xff]  ;;  %v1028_v55 = vpack.c.bf16 %v184_v52, %v183_v50  ;;  %v155_v57 = vld [vmem:[#allocation5 + $0x220] sm:$0xff]  ;;  %v173_v60 = vld [vmem:[#allocation5 + $0x2b0] sm:$0xff] }
  0x67   :  { %959 = vmatpush3.bf16.msra.mxu0 %v958_v24  ;;  %v156_v58 = vld [vmem:[#allocation5 + $0x228] sm:$0xff]  ;;  %v174_v61 = vld [vmem:[#allocation5 + $0x2b8] sm:$0xff]  ;;  %v79_v63 = vld [vmem:[#allocation2 + $0x30] sm:$0xff] }
  0x68   :  { %991 = vmatpush3.bf16.msra.mxu1 %v990_v25  ;;  %961 = vmatprep.subr.bf16.mxu0 %v960_v26  ;;  %v78_v62 = vld [vmem:[#allocation2 + $0x28] sm:$0xff]  ;;  %v1006_v0 = vpack.c.bf16 %v156_v58, %v155_v57  ;;  %v1008_v1 = vpack.c.bf16 %v174_v61, %v173_v60  ;;  %v157_v2 = vld [vmem:[#allocation5 + $0x230] sm:$0xff]  ;;  %v175_v5 = vld [vmem:[#allocation5 + $0x2c0] sm:$0xff] }
  0x69   :  { %993 = vmatprep.subr.bf16.mxu1 %v992_v30  ;;  %v158_v3 = vld [vmem:[#allocation5 + $0x238] sm:$0xff]  ;;  %v176_v6 = vld [vmem:[#allocation5 + $0x2c8] sm:$0xff]  ;;  %v159_v9 = vld [vmem:[#allocation5 + $0x240] sm:$0xff] }
  0x6a   :  { %v86_v4 = vld [vmem:[#allocation2 + $0x68] sm:$0xff]  ;;  %v1010_v7 = vpack.c.bf16 %v158_v3, %v157_v2  ;;  %v1012_v8 = vpack.c.bf16 %v176_v6, %v175_v5  ;;  %v160_v10 = vld [vmem:[#allocation5 + $0x248] sm:$0xff]  ;;  %v177_v11 = vld [vmem:[#allocation5 + $0x2d0] sm:$0xff] }
  0x6b   :  { %963 = vmatpush3.bf16.msra.mxu0 %v962_v34  ;;  %v178_v12 = vld [vmem:[#allocation5 + $0x2d8] sm:$0xff]  ;;  %v1014_v13 = vpack.c.bf16 %v160_v10, %v159_v9  ;;  %v161_v15 = vld [vmem:[#allocation5 + $0x250] sm:$0xff]  ;;  %v179_v17 = vld [vmem:[#allocation5 + $0x2e0] sm:$0xff] }
  0x6c   :  { %995 = vmatpush3.bf16.msra.mxu1 %v994_v35  ;;  %997 = vmatprep.subr.bf16.mxu0 %v996_v36  ;;  %v1016_v14 = vpack.c.bf16 %v178_v12, %v177_v11  ;;  %v162_v16 = vld [vmem:[#allocation5 + $0x258] sm:$0xff]  ;;  %v180_v18 = vld [vmem:[#allocation5 + $0x2e8] sm:$0xff]  ;;  %v163_v21 = vld [vmem:[#allocation5 + $0x260] sm:$0xff] }
  0x6d   :  { %1029 = vmatprep.subr.bf16.mxu1 %v1028_v55  ;;  %v1018_v19 = vpack.c.bf16 %v162_v16, %v161_v15  ;;  %v1020_v20 = vpack.c.bf16 %v180_v18, %v179_v17  ;;  %v164_v22 = vld [vmem:[#allocation5 + $0x268] sm:$0xff]  ;;  %v181_v23 = vld [vmem:[#allocation5 + $0x2f0] sm:$0xff]  ;;  %v182_v24 = vld [vmem:[#allocation5 + $0x2f8] sm:$0xff] }
  0x6e   :  { %257 = vmatmul.mubr.f32.vlgmr.msra.gmra.mrb[0].mxu0 %v73_v41  ;;  %v1022_v25 = vpack.c.bf16 %v164_v22, %v163_v21  ;;  %v1024_v26 = vpack.c.bf16 %v182_v24, %v181_v23  ;;  %v165_v27 = vld [vmem:[#allocation5 + $0x270] sm:$0xff]  ;;  %v166_v28 = vld [vmem:[#allocation5 + $0x278] sm:$0xff]  ;;  %v84_v32 = vld [vmem:[#allocation2 + $0x58] sm:$0xff] }
  0x6f   :  { %332 = vmatmul.mubr.f32.vlgmr.msra.gmra.mrb[0].mxu1 %v75_v42  ;;  %999 = vmatpush3.bf16.msra.mxu0 %v998_v43  ;;  %v1026_v29 = vpack.c.bf16 %v166_v28, %v165_v27  ;;  %v77_v30 = vld [vmem:[#allocation2 + $0x20] sm:$0xff]  ;;  %v495_v34 = vld [vmem:[#allocation7 + $0x8] sm:$0xff]  ;;  %v496_v35 = vld [vmem:[#allocation7 + $0x10] sm:$0xff] }
  0x70   :  { %1001 = vmatprep.subr.bf16.mxu0 %v1000_v44  ;;  %261 = vmatprep.mubr.f32.mxu0 %v81_v49  ;;  %v85_v31 = vld [vmem:[#allocation2 + $0x60] sm:$0xff]  ;;  %v497_v37 = vld [vmem:[#allocation7 + $0x18] sm:$0xff]  ;;  %v499_v40 = vld [vmem:[#allocation7 + $0x28] sm:$0xff] }
  0x71   :  { %336 = vmatprep.mubr.f32.mxu1 %v83_v51  ;;  %1031 = vmatpush3.bf16.msra.mxu1 %v1028_v55  ;;  %v494_v33 = vld [vmem:[#allocation7] sm:$0xff]  ;;  %v1036_v38 = vpack.c.bf16 %v497_v37, %v496_v35  ;;  %v500_v42 = vld [vmem:[#allocation7 + $0x30] sm:$0xff]  ;;  %v501_v43 = vld [vmem:[#allocation7 + $0x38] sm:$0xff] }
  0x72   :  { %262 = vmatmul.mubr.f32.gmra.mrb[2].mxu0 %v80_v54  ;;  %v1032_v36 = vpack.c.bf16 %v495_v34, %v494_v33  ;;  %v498_v39 = vld [vmem:[#allocation7 + $0x20] sm:$0xff]  ;;  %v1044_v44 = vpack.c.bf16 %v501_v43, %v500_v42  ;;  %v503_v46 = vld [vmem:[#allocation7 + $0x48] sm:$0xff]  ;;  %v504_v48 = vld [vmem:[#allocation7 + $0x50] sm:$0xff] }
  0x73   :  { %1003 = vmatpush3.bf16.msra.mxu0 %v1002_v53  ;;  %337 = vmatmul.mubr.f32.gmra.mrb[2].mxu1 %v82_v59  ;;  %v1040_v41 = vpack.c.bf16 %v499_v40, %v498_v39  ;;  %v502_v45 = vld [vmem:[#allocation7 + $0x40] sm:$0xff]  ;;  %v505_v49 = vld [vmem:[#allocation7 + $0x58] sm:$0xff]  ;;  %v507_v52 = vld [vmem:[#allocation7 + $0x68] sm:$0xff] }
  0x74   :  { %1005 = vmatprep.subr.bf16.mxu0 %v1004_v56  ;;  %406 = vmatprep.mubr.f32.mxu0 %v78_v62  ;;  %v1048_v47 = vpack.c.bf16 %v503_v46, %v502_v45  ;;  %v1052_v50 = vpack.c.bf16 %v505_v49, %v504_v48  ;;  %v506_v51 = vld [vmem:[#allocation7 + $0x60] sm:$0xff]  ;;  %v508_v54 = vld [vmem:[#allocation7 + $0x70] sm:$0xff]  ;;  %v509_v55 = vld [vmem:[#allocation7 + $0x78] sm:$0xff] }
  0x75   :  { %859 = vmatprep.mubr.msk.f32.mxu1 %vm185_vm0, %v79_v63  ;;  %1033 = vmatprep.subr.bf16.mxu1 %v1032_v36  ;;  %v1056_v53 = vpack.c.bf16 %v507_v52, %v506_v51  ;;  %v1060_v56 = vpack.c.bf16 %v509_v55, %v508_v54  ;;  %v587_v57 = vld [vmem:[#allocation8] sm:$0xff]  ;;  %v588_v58 = vld [vmem:[#allocation8 + $0x8] sm:$0xff]  ;;  %v589_v59 = vld [vmem:[#allocation8 + $0x10] sm:$0xff] }
  0x76   :  { %v1064_v60 = vpack.c.bf16 %v588_v58, %v587_v57  ;;  %v590_v61 = vld [vmem:[#allocation8 + $0x18] sm:$0xff]  ;;  %v591_v63 = vld [vmem:[#allocation8 + $0x20] sm:$0xff]  ;;  %v593_v2 = vld [vmem:[#allocation8 + $0x30] sm:$0xff] }
  0x77   :  { %1007 = vmatpush3.bf16.msra.mxu0 %v1006_v0  ;;  %860 = vmatmul.mubr.msk.f32.vlgmr.msra.gmra.mrb[4].mxu1 %vm185_vm0, %v86_v4  ;;  %v1068_v62 = vpack.c.bf16 %v590_v61, %v589_v59  ;;  %v592_v0 = vld [vmem:[#allocation8 + $0x28] sm:$0xff]  ;;  %v594_v3 = vld [vmem:[#allocation8 + $0x38] sm:$0xff]  ;;  %v595_v5 = vld [vmem:[#allocation8 + $0x40] sm:$0xff] }
  0x78   :  { %1009 = vmatprep.subr.bf16.mxu0 %v1008_v1  ;;  %1035 = vmatpush3.bf16.msra.mxu1 %v1032_v36  ;;  %v1072_v1 = vpack.c.bf16 %v592_v0, %v591_v63  ;;  %v1076_v4 = vpack.c.bf16 %v594_v3, %v593_v2  ;;  %v596_v6 = vld [vmem:[#allocation8 + $0x48] sm:$0xff]  ;;  %v598_v9 = vld [vmem:[#allocation8 + $0x58] sm:$0xff]  ;;  %v599_v11 = vld [vmem:[#allocation8 + $0x60] sm:$0xff] }
  0x79   :  { %1037 = vmatprep.subr.bf16.mxu1 %v1036_v38  ;;  %v600_v12 = vld [vmem:[#allocation8 + $0x68] sm:$0xff]  ;;  %v601_v42 = vld [vmem:[#allocation8 + $0x70] sm:$0xff]  ;;  %v602_v43 = vld [vmem:[#allocation8 + $0x78] sm:$0xff] }
  0x7b   :  { %1011 = vmatpush3.bf16.msra.mxu0 %v1010_v7  ;;  %v1080_v7 = vpack.c.bf16 %v596_v6, %v595_v5 }
  0x7c   :  { %1013 = vmatprep.subr.bf16.mxu0 %v1012_v8  ;;  %1039 = vmatpush3.bf16.msra.mxu1 %v1036_v38  ;;  %v597_v8 = vld [vmem:[#allocation8 + $0x50] sm:$0xff] }
  0x7d   :  { %1041 = vmatprep.subr.bf16.mxu1 %v1040_v41  ;;  %v1084_v10 = vpack.c.bf16 %v598_v9, %v597_v8 }
  0x7f   :  { %1015 = vmatpush3.bf16.msra.mxu0 %v1014_v13  ;;  %v1088_v13 = vpack.c.bf16 %v600_v12, %v599_v11 }
  0x80   :  { %1017 = vmatprep.subr.bf16.mxu0 %v1016_v14  ;;  %1043 = vmatpush3.bf16.msra.mxu1 %v1040_v41 }
  0x81   :  { %1045 = vmatprep.subr.bf16.mxu1 %v1044_v44 }
  0x83   :  { %1019 = vmatpush3.bf16.msra.mxu0 %v1018_v19 }
  0x84   :  { %1021 = vmatprep.subr.bf16.mxu0 %v1020_v20  ;;  %1047 = vmatpush3.bf16.msra.mxu1 %v1044_v44  ;;  %v1092_v44 = vpack.c.bf16 %v602_v43, %v601_v42 }
  0x85   :  { %1049 = vmatprep.subr.bf16.mxu1 %v1048_v47 }
  0x87   :  { %1023 = vmatpush3.bf16.msra.mxu0 %v1022_v25 }
  0x88   :  { %1025 = vmatprep.subr.bf16.mxu0 %v1024_v26  ;;  %1051 = vmatpush3.bf16.msra.mxu1 %v1048_v47 }
  0x89   :  { %1053 = vmatprep.subr.bf16.mxu1 %v1052_v50 }
  0x8b   :  { %1027 = vmatpush3.bf16.msra.mxu0 %v1026_v29 }
  0x8c   :  { %1055 = vmatpush3.bf16.msra.mxu1 %v1052_v50  ;;  %1065 = vmatprep.subr.bf16.mxu0 %v1064_v60 }
  0x8d   :  { %1057 = vmatprep.subr.bf16.mxu1 %v1056_v53 }
  0x8e   :  { %407 = vmatmul.mubr.f32.vlgmr.msra.gmra.mrb[4].mxu0 %v77_v30 }
  0x8f   :  { %411 = vmatprep.mubr.f32.mxu0 %v85_v31  ;;  %1067 = vmatpush3.bf16.msra.mxu0 %v1064_v60 }
  0x90   :  { %1059 = vmatpush3.bf16.msra.mxu1 %v1056_v53  ;;  %1069 = vmatprep.subr.bf16.mxu0 %v1068_v62 }
  0x91   :  { %1061 = vmatprep.subr.bf16.mxu1 %v1060_v56 }
  0x92   :  { %412 = vmatmul.mubr.f32.gmra.mrb[6].mxu0 %v84_v32 }
  0x93   :  { %1071 = vmatpush3.bf16.msra.mxu0 %v1068_v62 }
  0x94   :  { %1063 = vmatpush3.bf16.msra.mxu1 %v1060_v56  ;;  %1073 = vmatprep.subr.bf16.mxu0 %v1072_v1 }
  0x97   :  { %1075 = vmatpush3.bf16.msra.mxu0 %v1072_v1 }
  0x98   :  { %1077 = vmatprep.subr.bf16.mxu0 %v1076_v4 }
  0x9b   :  { %1079 = vmatpush3.bf16.msra.mxu0 %v1076_v4 }
  0x9c   :  { %1081 = vmatprep.subr.bf16.mxu0 %v1080_v7 }
  0x9f   :  { %1083 = vmatpush3.bf16.msra.mxu0 %v1080_v7 }
  0xa0   :  { %1085 = vmatprep.subr.bf16.mxu0 %v1084_v10 }
  0xa3   :  { %1087 = vmatpush3.bf16.msra.mxu0 %v1084_v10 }
  0xa4   :  { %1089 = vmatprep.subr.bf16.mxu0 %v1088_v13 }
  0xa7   :  { %1091 = vmatpush3.bf16.msra.mxu0 %v1088_v13 }
  0xa8   :  { %1093 = vmatprep.subr.bf16.mxu0 %v1092_v44 }
  0xab   :  { %1095 = vmatpush3.bf16.msra.mxu0 %v1092_v44 }
 0x141   :  { %v733_v14 = vpop.f32.mrb[0].mxu0 }
 0x142   :  { %v771_v15 = vpop.f32.mrb[0].mxu1  ;;  %v734_v16 = vpop.f32.mrb[1].mxu0 }
 0x143   :  { %v735_v17 = vadd.f32 %v734_v16, %v733_v14  ;;  %v772_v18 = vpop.f32.mrb[1].mxu1 }
 0x144   :  { %v773_v19 = vadd.f32 %v772_v18, %v771_v15 }
 0x145   :  { %v736_v20 = vpop.f32.mrb[2].mxu0 }
 0x146   :  { %v334_v21 = vadd.f32 %v773_v19, %v735_v17  ;;  %v774_v22 = vpop.f32.mrb[2].mxu1  ;;  %v737_v23 = vpop.f32.mrb[3].mxu0 }
 0x147   :  { %v738_v24 = vadd.f32 %v737_v23, %v736_v20  ;;  %v775_v25 = vpop.f32.mrb[3].mxu1 }
 0x148   :  { %v776_v26 = vadd.f32 %v775_v25, %v774_v22 }
 0x14a   :  { %v339_v27 = vadd.f32 %v776_v26, %v738_v24  ;;  %v861_v28 = vpop.f32.mrb[4].mxu1 }
 0x14b   :  { %v483_v29 = vpop.f32.mrb[5].mxu1 }
 0x161   :  { %v809_v30 = vpop.f32.mrb[4].mxu0 }
 0x162   :  { %v810_v31 = vpop.f32.mrb[5].mxu0 }
 0x163   :  { %v811_v32 = vadd.f32 %v810_v31, %v809_v30 }
 0x165   :  { %v812_v33 = vpop.f32.mrb[6].mxu0  ;;  %v409_v34 = vadd.f32 %v811_v32, %v334_v21 }
 0x166   :  { %v813_v35 = vpop.f32.mrb[7].mxu0 }
 0x167   :  { %v814_v36 = vadd.f32 %v813_v35, %v812_v33  ;;  %v484_v37 = vadd.f32 %v483_v29, %v409_v34 }
 0x169   :  { %v414_v38 = vadd.f32 %v814_v36, %v339_v27  ;;  %v492_v39 = vmax.f32 %v484_v37, 0.0 }
 0x16b   :  { %v489_v40 = vadd.f32 %v861_v28, %v414_v38  ;;  %894 = vmatprep.mubr.f32.mxu1 %v492_v39 }
 0x16d   :  { %v493_v41 = vmax.f32 %v489_v40, 0.0 }
 0x16f   :  { %895 = vmatmul.mubr.f32.vlgmr.msra.gmra.mrb[6].mxu1 %v493_v41 }
 0x242   :  { %v896_v45 = vpop.f32.mrb[6].mxu1 }
 0x243   :  { %v576_v46 = vpop.f32.mrb[7].mxu1  ;;  %v586_v48 = vmax.f32 %v896_v45, 0.0 }
 0x244   :  { %v585_v47 = vmax.f32 %v576_v46, 0.0 }
 0x246   :  { %929 = vmatprep.mubr.f32.mxu0 %v585_v47 }
 0x247   :  { %930 = vmatmul.mubr.f32.vlgmr.msra.gmra.mrb[8].mxu0 %v586_v48 }
 0x31a   :  { %v931_v49 = vpop.f32.mrb[8].mxu0 }
 0x31b   :  { %679 = vst [vmem:[#allocation10 + $0x8] sm:$0xff] %v931_v49  ;;  %v669_v50 = vpop.f32.mrb[9].mxu0 }
 0x31c   :  { %678 = vst [vmem:[#allocation10] sm:$0xff] %v669_v50 }
 0x31d   :  { %1204 = shalt.err (!%p1201_p8)
}
 0x31e   :  { %s1205_s17 = scalar_lea.hbm %s1340_s4, 256 }
 0x31f   :  { %p1206_p9 = scmp.ne.s32.totalorder %s1340_s4, %s1205_s17  ;;  %p1209_p10 = scmp.lt.u32.totalorder %s1205_s17, %s1340_s4 }
 0x321   :  { %p1211_p11 = pnand %p1209_p10, %p1206_p9 }
 0x323   :  { %1214 = shalt.err (!%p1211_p11)
}
 0x324   :  { %691 = dma.vmem_to_hbm [thread:$0]  %s686_s13, 256, %s1340_s4, [#allocation4], %s1224_s25, %s1224_s25, %s1225_s26  }
 0x325   :  { %1221 = dma.done.wait [#allocation4], 256  }
 0x326   :  { %1222 = vsyncadd [#allocation4], 4294967040 }
 0x327   :  { %695 = vsyncpa [#allocation3], 1 }
 0x328   :  { %696 = vsyncpa [#allocation6], 1 }
 0x329   :  { %697 = vsyncpa [#allocation9], 1 }
 0x32a   :  { %698 = vsyncpa [#allocation4], 1 }

</bundles_post_ra>
